<compile_context>
chip_gen: v7x
topology: tpu7x:2x2x1
jax: 0.10.0
libtpu: 0.0.40
codegen_flags: <defaults>
</compile_context>

<pallas_src>
import jax
import jax.numpy as jnp
from jax.experimental import pallas as pl
from jax.experimental.pallas import tpu as pltpu


# ----------------------------------------------------------------------------
# helpers
# ----------------------------------------------------------------------------
_MAX_ROW_TILE = 512   # projection row-tile target (flattened B*S rows)
_MAX_KV_TILE = 512    # flash-attention KV tile target


def _vmem_limit_bytes():
    # Explicit scoped-VMEM budget with headroom below physical capacity
    # (128 MiB v5e/v6e -> ~112 MiB, 64 MiB v7x -> ~56 MiB).
    try:
        cap = pltpu.get_tpu_info().vmem_capacity_bytes
    except Exception:
        cap = 64 * 1024 * 1024
    return int(cap * 7 // 8)


def _row_tile(rows):
    return rows if rows <= _MAX_ROW_TILE else _MAX_ROW_TILE


def _kv_tile(seq):
    if seq <= _MAX_KV_TILE:
        return seq
    for t in (512, 384, 256, 128):
        if seq % t == 0:
            return t
    # TODO(synk): pad/mask ragged KV tiles when S is not a multiple of 128.
    return seq


# ----------------------------------------------------------------------------
# Kernel 1: fused Q/K/V projection (low-rank path pre-folded into the weights)
#   q = x_q @ Wq_eff + bq ; k = x_k @ Wk_eff + bk ; v = x_v @ Wv_eff + bv
# grid = (cdiv(B*S, tm),): row tiles of the flattened (B*S) axis.
# bf16 operands, f32 MXU accumulation + bias, bf16 stores.
# ----------------------------------------------------------------------------
def _qkv_proj_kernel(xq_ref, xk_ref, xv_ref,
                     wq_ref, bq_ref, wk_ref, bk_ref, wv_ref, bv_ref,
                     q_ref, k_ref, v_ref):
    q_ref[...] = (jnp.dot(xq_ref[...], wq_ref[...],
                          preferred_element_type=jnp.float32)
                  + bq_ref[...]).astype(q_ref.dtype)
    k_ref[...] = (jnp.dot(xk_ref[...], wk_ref[...],
                          preferred_element_type=jnp.float32)
                  + bk_ref[...]).astype(k_ref.dtype)
    v_ref[...] = (jnp.dot(xv_ref[...], wv_ref[...],
                          preferred_element_type=jnp.float32)
                  + bv_ref[...]).astype(v_ref.dtype)


def qkv_project(xq, xk, xv, wq, bq, wk, bk, wv, bv):
    R, D = xq.shape
    N = wq.shape[1]
    tm = _row_tile(R)
    grid = (pl.cdiv(R, tm),)

    x_spec = pl.BlockSpec((tm, D), lambda i: (i, 0))
    w_spec = pl.BlockSpec((D, N), lambda i: (0, 0))    # resident across steps
    b_spec = pl.BlockSpec((1, N), lambda i: (0, 0))
    o_spec = pl.BlockSpec((tm, N), lambda i: (i, 0))

    out_sds = jax.ShapeDtypeStruct((R, N), jnp.bfloat16)
    return pl.pallas_call(
        _qkv_proj_kernel,
        out_shape=(out_sds, out_sds, out_sds),
        grid_spec=pltpu.PrefetchScalarGridSpec(
            num_scalar_prefetch=0,
            grid=grid,
            in_specs=[x_spec, x_spec, x_spec,
                      w_spec, b_spec, w_spec, b_spec, w_spec, b_spec],
            out_specs=[o_spec, o_spec, o_spec],
        ),
        compiler_params=pltpu.CompilerParams(
            dimension_semantics=("parallel",),
            vmem_limit_bytes=_vmem_limit_bytes()),
    )(xq, xk, xv, wq, bq, wk, bk, wv, bv)


# ----------------------------------------------------------------------------
# Kernel 2: flash-style masked attention (KV-tiled, running max/sum/acc)
#   scores = q @ k^T ; masked_fill(-2**31) ; online softmax ; @ v
# grid = (B*h, nkv).  The mask stays (B, S, S); index_map maps bh -> bh // h.
# ----------------------------------------------------------------------------
def _flash_attn_kernel(q_ref, k_ref, v_ref, m_ref, o_ref, m_sc, l_sc, acc_sc):
    kv = pl.program_id(1)

    @pl.when(kv == 0)
    def _():
        m_sc[...] = jnp.full(m_sc.shape, -jnp.inf, jnp.float32)
        l_sc[...] = jnp.zeros(l_sc.shape, jnp.float32)
        acc_sc[...] = jnp.zeros(acc_sc.shape, jnp.float32)

    q = q_ref[...]                                   # (S, 128)  bf16
    k = k_ref[...]                                   # (tk, 128) bf16
    v = v_ref[...]                                   # (tk, 128) bf16

    # q @ k^T without materializing k.T (contract last dim of both operands).
    s = jax.lax.dot_general(q, k, (((1,), (1,)), ((), ())),
                            preferred_element_type=jnp.float32)   # (S, tk) f32
    # masked_fill with -2**31, exactly like the torch module.
    s = jnp.where(m_ref[...] != 0, s, jnp.float32(-2.0 ** 31))

    m_prev = m_sc[...]
    m_new = jnp.maximum(m_prev, jnp.max(s, axis=-1, keepdims=True))
    alpha = jnp.exp(m_prev - m_new)
    e = jnp.exp(s - m_new)

    l_sc[...] = alpha * l_sc[...] + jnp.sum(e, axis=-1, keepdims=True)
    acc_sc[...] = alpha * acc_sc[...] + jnp.dot(
        e.astype(v.dtype), v, preferred_element_type=jnp.float32)
    m_sc[...] = m_new

    @pl.when(kv == pl.num_programs(1) - 1)
    def _():
        # deferred softmax normalization (EUP reciprocal, no (S,S) divide)
        o_ref[...] = (acc_sc[...] *
                      pl.reciprocal(l_sc[...], approx=True)).astype(o_ref.dtype)


def attention_flash(q, k, v, mask_i8, num_heads):
    BH, S, DH = q.shape
    tk = _kv_tile(S)
    nkv = pl.cdiv(S, tk)

    q_spec = pl.BlockSpec((None, S, DH), lambda bh, j: (bh, 0, 0))
    kv_spec = pl.BlockSpec((None, tk, DH), lambda bh, j: (bh, j, 0))
    m_spec = pl.BlockSpec((None, S, tk), lambda bh, j: (bh // num_heads, 0, j))
    o_spec = pl.BlockSpec((None, S, DH), lambda bh, j: (bh, 0, 0))

    return pl.pallas_call(
        _flash_attn_kernel,
        out_shape=jax.ShapeDtypeStruct((BH, S, DH), jnp.bfloat16),
        grid_spec=pltpu.PrefetchScalarGridSpec(
            num_scalar_prefetch=0,
            grid=(BH, nkv),
            in_specs=[q_spec, kv_spec, kv_spec, m_spec],
            out_specs=o_spec,
            scratch_shapes=[pltpu.VMEM((S, 1), jnp.float32),   # running max
                            pltpu.VMEM((S, 1), jnp.float32),   # running sum
                            pltpu.VMEM((S, DH), jnp.float32)], # acc
        ),
        compiler_params=pltpu.CompilerParams(
            dimension_semantics=("parallel", "arbitrary"),
            vmem_limit_bytes=_vmem_limit_bytes()),
    )(q, k, v, mask_i8)


# ----------------------------------------------------------------------------
# Kernel 3: output projection  ->  x @ W_o^T + b_o, row-tiled over B*S.
# ----------------------------------------------------------------------------
def _out_proj_kernel(x_ref, w_ref, b_ref, o_ref):
    o_ref[...] = (jnp.dot(x_ref[...], w_ref[...],
                          preferred_element_type=jnp.float32) + b_ref[...])


def out_project(x, w_t, b):
    R, N = x.shape
    D = w_t.shape[1]
    tm = _row_tile(R)
    grid = (pl.cdiv(R, tm),)

    return pl.pallas_call(
        _out_proj_kernel,
        out_shape=jax.ShapeDtypeStruct((R, D), jnp.float32),
        grid_spec=pltpu.PrefetchScalarGridSpec(
            num_scalar_prefetch=0,
            grid=grid,
            in_specs=[pl.BlockSpec((tm, N), lambda i: (i, 0)),
                      pl.BlockSpec((N, D), lambda i: (0, 0)),
                      pl.BlockSpec((1, D), lambda i: (0, 0))],
            out_specs=pl.BlockSpec((tm, D), lambda i: (i, 0)),
        ),
        compiler_params=pltpu.CompilerParams(
            dimension_semantics=("parallel",),
            vmem_limit_bytes=_vmem_limit_bytes()),
    )(x, w_t, b)


# ----------------------------------------------------------------------------
# Full module forward (matches MultiHeadedAttention.forward)
# ----------------------------------------------------------------------------
def multi_headed_attention(params, query, key, value, mask,
                           W_A, W_B, W_C, W_D, W_E, W_F, h):
    B, S, D = query.shape
    hp = jax.lax.Precision.HIGHEST

    # Fold the rank-r adapters into the projection weights once (exact up to
    # f32 rounding: x @ W + x @ (W_A @ W_B) == x @ (W + W_A @ W_B)), then cast
    # the MXU operands to bf16 (accumulation stays f32 inside the kernels).
    wq_eff = (params["wq_t"] + jnp.matmul(W_A, W_B, precision=hp)).astype(jnp.bfloat16)
    wk_eff = (params["wk_t"] + jnp.matmul(W_C, W_D, precision=hp)).astype(jnp.bfloat16)
    wv_eff = (params["wv_t"] + jnp.matmul(W_E, W_F, precision=hp)).astype(jnp.bfloat16)
    wo = params["wo_t"].astype(jnp.bfloat16)

    # Row-tiled projections over the flattened (B*S) row axis.
    xq = query.reshape(B * S, D).astype(jnp.bfloat16)
    xk = key.reshape(B * S, D).astype(jnp.bfloat16)
    xv = value.reshape(B * S, D).astype(jnp.bfloat16)

    q, k, v = qkv_project(xq, xk, xv,
                          wq_eff, params["bq"],
                          wk_eff, params["bk"],
                          wv_eff, params["bv"])

    # Row-major reshape, exactly torch's .reshape([B, h, -1, 128]) (zero-copy),
    # then flatten (B, h) into one parallel grid axis of extent B*h.
    q = q.reshape(B * h, S, 128)
    k = k.reshape(B * h, S, 128)
    v = v.reshape(B * h, S, 128)

    # Mask stays (B, S, S), int8 (no int32 widening, no per-head broadcast).
    mask_i8 = mask.astype(jnp.int8)

    o = attention_flash(q, k, v, mask_i8, h)

    # torch .contiguous().view(B, -1, h*128) (zero-copy row-major reshape)
    x = o.reshape(B * S, h * 128)

    return out_project(x, wo, params["bo"]).reshape(B, S, D)


# ----------------------------------------------------------------------------
# Pure-JAX f32 reference, computed the "unfolded" way, mirroring PyTorch.
# ----------------------------------------------------------------------------
def reference_forward(params, query, key, value, mask,
                      W_A, W_B, W_C, W_D, W_E, W_F, h):
    hp = jax.lax.Precision.HIGHEST
    B, S, _ = query.shape
    mask4 = jnp.broadcast_to(mask[:, None, :, :], (B, h, S, S))

    def proj(x, w_t, b, wa, wb):
        return (jnp.matmul(x, w_t, precision=hp) + b
                + jnp.matmul(x, jnp.matmul(wa, wb, precision=hp), precision=hp))

    q = proj(query, params["wq_t"], params["bq"], W_A, W_B).reshape(B, h, S, 128)
    k = proj(key, params["wk_t"], params["bk"], W_C, W_D).reshape(B, h, S, 128)
    v = proj(value, params["wv_t"], params["bv"], W_E, W_F).reshape(B, h, S, 128)

    scores = jnp.matmul(q, jnp.swapaxes(k, -2, -1), precision=hp)
    scores = jnp.where(mask4, scores, jnp.float32(-2.0 ** 31))
    p = jax.nn.softmax(scores, axis=-1)
    x = jnp.matmul(p, v, precision=hp).reshape(B, S, h * 128)
    return jnp.matmul(x, params["wo_t"], precision=hp) + params["bo"]


if __name__ == "__main__":
    # Small shapes consistent with the module
    B, S, d_model, h, rank = 2, 8, 32, 2, 4
    N = 128 * h

    key0 = jax.random.PRNGKey(0)
    ks = jax.random.split(key0, 16)
    scale = 0.05

    # Deterministic parameter init (weights stored pre-transposed: (in, out))
    params = {
        "wq_t": scale * jax.random.normal(ks[0], (d_model, N), jnp.float32),
        "bq":   scale * jax.random.normal(ks[1], (1, N), jnp.float32),
        "wk_t": scale * jax.random.normal(ks[2], (d_model, N), jnp.float32),
        "bk":   scale * jax.random.normal(ks[3], (1, N), jnp.float32),
        "wv_t": scale * jax.random.normal(ks[4], (d_model, N), jnp.float32),
        "bv":   scale * jax.random.normal(ks[5], (1, N), jnp.float32),
        "wo_t": scale * jax.random.normal(ks[6], (N, d_model), jnp.float32),
        "bo":   scale * jax.random.normal(ks[7], (1, d_model), jnp.float32),
    }
    W_A = scale * jax.random.normal(ks[8], (d_model, rank), jnp.float32)
    W_B = scale * jax.random.normal(ks[9], (rank, N), jnp.float32)
    W_C = scale * jax.random.normal(ks[10], (d_model, rank), jnp.float32)
    W_D = scale * jax.random.normal(ks[11], (rank, N), jnp.float32)
    W_E = scale * jax.random.normal(ks[12], (d_model, rank), jnp.float32)
    W_F = scale * jax.random.normal(ks[13], (rank, N), jnp.float32)

    query = jax.random.normal(ks[14], (B, S, d_model), jnp.float32)
    kv_key = jax.random.split(ks[15], 2)
    key_in = jax.random.normal(kv_key[0], (B, S, d_model), jnp.float32)
    value_in = jax.random.normal(kv_key[1], (B, S, d_model), jnp.float32)

    # boolean mask (B, S, S): causal-style lower triangular
    mask = jnp.broadcast_to(jnp.tril(jnp.ones((S, S), dtype=bool)), (B, S, S))

    out = multi_headed_attention(params, query, key_in, value_in, mask,
                                 W_A, W_B, W_C, W_D, W_E, W_F, h)
    out = jax.block_until_ready(out)

    # Sanity check against the pure-f32 JAX reference.  Tolerance covers the
    # bf16 MXU operands (~0.4% per-operand rounding across 4 chained matmuls).
    ref = reference_forward(params, query, key_in, value_in, mask,
                            W_A, W_B, W_C, W_D, W_E, W_F, h)
    assert out.shape == (B, S, d_model)
    max_err = float(jnp.max(jnp.abs(out - ref)))
    if max_err > 5e-2:
        raise RuntimeError(f"mismatch vs reference: max abs err = {max_err}")

    print("KERNEL_OK")
</pallas_src>

<mosaic_0001>
module attributes {stable_mosaic.version = 11 : i64} {
  func.func @_qkv_proj_kernel(%arg0: i32, %arg1: memref<16x32xbf16, #tpu.memory_space<vmem>>, %arg2: memref<16x32xbf16, #tpu.memory_space<vmem>>, %arg3: memref<16x32xbf16, #tpu.memory_space<vmem>>, %arg4: memref<32x256xbf16, #tpu.memory_space<vmem>>, %arg5: memref<1x256xf32, #tpu.memory_space<vmem>>, %arg6: memref<32x256xbf16, #tpu.memory_space<vmem>>, %arg7: memref<1x256xf32, #tpu.memory_space<vmem>>, %arg8: memref<32x256xbf16, #tpu.memory_space<vmem>>, %arg9: memref<1x256xf32, #tpu.memory_space<vmem>>, %arg10: memref<16x256xbf16, #tpu.memory_space<vmem>>, %arg11: memref<16x256xbf16, #tpu.memory_space<vmem>>, %arg12: memref<16x256xbf16, #tpu.memory_space<vmem>>) attributes {dimension_semantics = [#tpu.dimension_semantics<parallel>], iteration_bounds = array<i64: 1>, scalar_prefetch = 0 : i64, scratch_operands = 0 : i64, tpu.core_type = #tpu.core_type<tc>, window_params = [{transform_indices = @transform_0, window_bounds = array<i64: 16, 32>}, {transform_indices = @transform_1, window_bounds = array<i64: 16, 32>}, {transform_indices = @transform_2, window_bounds = array<i64: 16, 32>}, {pipeline_mode = #tpu.pipeline_mode<synchronous>, transform_indices = @transform_3, window_bounds = array<i64: 32, 256>}, {pipeline_mode = #tpu.pipeline_mode<synchronous>, transform_indices = @transform_4, window_bounds = array<i64: 1, 256>}, {pipeline_mode = #tpu.pipeline_mode<synchronous>, transform_indices = @transform_5, window_bounds = array<i64: 32, 256>}, {pipeline_mode = #tpu.pipeline_mode<synchronous>, transform_indices = @transform_6, window_bounds = array<i64: 1, 256>}, {pipeline_mode = #tpu.pipeline_mode<synchronous>, transform_indices = @transform_7, window_bounds = array<i64: 32, 256>}, {pipeline_mode = #tpu.pipeline_mode<synchronous>, transform_indices = @transform_8, window_bounds = array<i64: 1, 256>}, {transform_indices = @transform_9, window_bounds = array<i64: 16, 256>}, {transform_indices = @transform_10, window_bounds = array<i64: 16, 256>}, {transform_indices = @transform_11, window_bounds = array<i64: 16, 256>}]} {
    %c0 = arith.constant 0 : index
    %c0_0 = arith.constant 0 : index
    %0 = vector.load %arg1[%c0, %c0_0] : memref<16x32xbf16, #tpu.memory_space<vmem>>, vector<16x32xbf16>
    %c0_1 = arith.constant 0 : index
    %c0_2 = arith.constant 0 : index
    %1 = vector.load %arg4[%c0_1, %c0_2] : memref<32x256xbf16, #tpu.memory_space<vmem>>, vector<32x256xbf16>
    %cst = arith.constant dense<0.000000e+00> : vector<16x256xf32>
    %2 = tpu.matmul %0, %1, %cst {dimension_numbers = #tpu.dot_dimension_numbers<[1], [0], [0], [1], [0, 0, 1, 1], [], []>} : vector<16x32xbf16>, vector<32x256xbf16>, vector<16x256xf32> -> vector<16x256xf32>
    %c0_3 = arith.constant 0 : index
    %c0_4 = arith.constant 0 : index
    %3 = vector.load %arg5[%c0_3, %c0_4] : memref<1x256xf32, #tpu.memory_space<vmem>>, vector<1x256xf32>
    %4 = vector.broadcast %3 : vector<1x256xf32> to vector<16x256xf32>
    %5 = arith.addf %2, %4 : vector<16x256xf32>
    %6 = arith.truncf %5 : vector<16x256xf32> to vector<16x256xbf16>
    %c0_5 = arith.constant 0 : index
    %c0_6 = arith.constant 0 : index
    %7 = vector.load %arg10[%c0_5, %c0_6] : memref<16x256xbf16, #tpu.memory_space<vmem>>, vector<16x256xbf16>
    tpu.vector_store %arg10[%c0_5, %c0_6], %6 {strides = array<i32>} : memref<16x256xbf16, #tpu.memory_space<vmem>>, vector<16x256xbf16>,
    %c0_7 = arith.constant 0 : index
    %c0_8 = arith.constant 0 : index
    %8 = vector.load %arg2[%c0_7, %c0_8] : memref<16x32xbf16, #tpu.memory_space<vmem>>, vector<16x32xbf16>
    %c0_9 = arith.constant 0 : index
    %c0_10 = arith.constant 0 : index
    %9 = vector.load %arg6[%c0_9, %c0_10] : memref<32x256xbf16, #tpu.memory_space<vmem>>, vector<32x256xbf16>
    %cst_11 = arith.constant dense<0.000000e+00> : vector<16x256xf32>
    %10 = tpu.matmul %8, %9, %cst_11 {dimension_numbers = #tpu.dot_dimension_numbers<[1], [0], [0], [1], [0, 0, 1, 1], [], []>} : vector<16x32xbf16>, vector<32x256xbf16>, vector<16x256xf32> -> vector<16x256xf32>
    %c0_12 = arith.constant 0 : index
    %c0_13 = arith.constant 0 : index
    %11 = vector.load %arg7[%c0_12, %c0_13] : memref<1x256xf32, #tpu.memory_space<vmem>>, vector<1x256xf32>
    %12 = vector.broadcast %11 : vector<1x256xf32> to vector<16x256xf32>
    %13 = arith.addf %10, %12 : vector<16x256xf32>
    %14 = arith.truncf %13 : vector<16x256xf32> to vector<16x256xbf16>
    %c0_14 = arith.constant 0 : index
    %c0_15 = arith.constant 0 : index
    %15 = vector.load %arg11[%c0_14, %c0_15] : memref<16x256xbf16, #tpu.memory_space<vmem>>, vector<16x256xbf16>
    tpu.vector_store %arg11[%c0_14, %c0_15], %14 {strides = array<i32>} : memref<16x256xbf16, #tpu.memory_space<vmem>>, vector<16x256xbf16>,
    %c0_16 = arith.constant 0 : index
    %c0_17 = arith.constant 0 : index
    %16 = vector.load %arg3[%c0_16, %c0_17] : memref<16x32xbf16, #tpu.memory_space<vmem>>, vector<16x32xbf16>
    %c0_18 = arith.constant 0 : index
    %c0_19 = arith.constant 0 : index
    %17 = vector.load %arg8[%c0_18, %c0_19] : memref<32x256xbf16, #tpu.memory_space<vmem>>, vector<32x256xbf16>
    %cst_20 = arith.constant dense<0.000000e+00> : vector<16x256xf32>
    %18 = tpu.matmul %16, %17, %cst_20 {dimension_numbers = #tpu.dot_dimension_numbers<[1], [0], [0], [1], [0, 0, 1, 1], [], []>} : vector<16x32xbf16>, vector<32x256xbf16>, vector<16x256xf32> -> vector<16x256xf32>
    %c0_21 = arith.constant 0 : index
    %c0_22 = arith.constant 0 : index
    %19 = vector.load %arg9[%c0_21, %c0_22] : memref<1x256xf32, #tpu.memory_space<vmem>>, vector<1x256xf32>
    %20 = vector.broadcast %19 : vector<1x256xf32> to vector<16x256xf32>
    %21 = arith.addf %18, %20 : vector<16x256xf32>
    %22 = arith.truncf %21 : vector<16x256xf32> to vector<16x256xbf16>
    %c0_23 = arith.constant 0 : index
    %c0_24 = arith.constant 0 : index
    %23 = vector.load %arg12[%c0_23, %c0_24] : memref<16x256xbf16, #tpu.memory_space<vmem>>, vector<16x256xbf16>
    tpu.vector_store %arg12[%c0_23, %c0_24], %22 {strides = array<i32>} : memref<16x256xbf16, #tpu.memory_space<vmem>>, vector<16x256xbf16>,
    return
  }
  func.func @transform_0(%arg0: i32) -> (i32, i32) {
    %c0_i32 = arith.constant 0 : i32
    %c0_i32_0 = arith.constant 0 : i32
    return %arg0, %c0_i32 : i32, i32
  }
  func.func @transform_1(%arg0: i32) -> (i32, i32) {
    %c0_i32 = arith.constant 0 : i32
    %c0_i32_0 = arith.constant 0 : i32
    return %arg0, %c0_i32 : i32, i32
  }
  func.func @transform_2(%arg0: i32) -> (i32, i32) {
    %c0_i32 = arith.constant 0 : i32
    %c0_i32_0 = arith.constant 0 : i32
    return %arg0, %c0_i32 : i32, i32
  }
  func.func @transform_3(%arg0: i32) -> (i32, i32) {
    %c0_i32 = arith.constant 0 : i32
    %c0_i32_0 = arith.constant 0 : i32
    %c0_i32_1 = arith.constant 0 : i32
    return %c0_i32, %c0_i32_0 : i32, i32
  }
  func.func @transform_4(%arg0: i32) -> (i32, i32) {
    %c0_i32 = arith.constant 0 : i32
    %c0_i32_0 = arith.constant 0 : i32
    %c0_i32_1 = arith.constant 0 : i32
    return %c0_i32, %c0_i32_0 : i32, i32
  }
  func.func @transform_5(%arg0: i32) -> (i32, i32) {
    %c0_i32 = arith.constant 0 : i32
    %c0_i32_0 = arith.constant 0 : i32
    %c0_i32_1 = arith.constant 0 : i32
    return %c0_i32, %c0_i32_0 : i32, i32
  }
  func.func @transform_6(%arg0: i32) -> (i32, i32) {
    %c0_i32 = arith.constant 0 : i32
    %c0_i32_0 = arith.constant 0 : i32
    %c0_i32_1 = arith.constant 0 : i32
    return %c0_i32, %c0_i32_0 : i32, i32
  }
  func.func @transform_7(%arg0: i32) -> (i32, i32) {
    %c0_i32 = arith.constant 0 : i32
    %c0_i32_0 = arith.constant 0 : i32
    %c0_i32_1 = arith.constant 0 : i32
    return %c0_i32, %c0_i32_0 : i32, i32
  }
  func.func @transform_8(%arg0: i32) -> (i32, i32) {
    %c0_i32 = arith.constant 0 : i32
    %c0_i32_0 = arith.constant 0 : i32
    %c0_i32_1 = arith.constant 0 : i32
    return %c0_i32, %c0_i32_0 : i32, i32
  }
  func.func @transform_9(%arg0: i32) -> (i32, i32) {
    %c0_i32 = arith.constant 0 : i32
    %c0_i32_0 = arith.constant 0 : i32
    return %arg0, %c0_i32 : i32, i32
  }
  func.func @transform_10(%arg0: i32) -> (i32, i32) {
    %c0_i32 = arith.constant 0 : i32
    %c0_i32_0 = arith.constant 0 : i32
    return %arg0, %c0_i32 : i32, i32
  }
  func.func @transform_11(%arg0: i32) -> (i32, i32) {
    %c0_i32 = arith.constant 0 : i32
    %c0_i32_0 = arith.constant 0 : i32
    return %arg0, %c0_i32 : i32, i32
  }
}

</mosaic_0001>

<bundles_post_ra>
// kernel: tpu_custom_call.1
= control target key start
LH: loop header
LB: loop body
LE: loop exit
PB: predicated region body
PF: predicated region fallthrough
CT: control target
= control target key end

     0   :  { %17 = vsyncpa [#allocation3], 0  ;;  %s1005_s0 = inlined_call_operand.hbm [shape: bf16[16,32], index: 0, kind: input, shape index: {}]   ;;  %s1006_s1 = inlined_call_operand.hbm [shape: bf16[16,32], index: 1, kind: input, shape index: {}]   ;;  %s1007_s2 = inlined_call_operand.hbm [shape: bf16[16,32], index: 2, kind: input, shape index: {}]   ;;  %s1008_s3 = inlined_call_operand.hbm [shape: bf16[32,256], index: 3, kind: input, shape index: {}]   ;;  %s1009_s4 = inlined_call_operand.vmem [shape: f32[1,256], index: 4, kind: input, shape index: {}]   ;;  %s1010_s5 = inlined_call_operand.hbm [shape: bf16[32,256], index: 5, kind: input, shape index: {}]   ;;  %s1011_s6 = inlined_call_operand.vmem [shape: f32[1,256], index: 6, kind: input, shape index: {}]   ;;  %s1012_s7 = inlined_call_operand.hbm [shape: bf16[32,256], index: 7, kind: input, shape index: {}]   ;;  %s1013_s8 = inlined_call_operand.vmem [shape: f32[1,256], index: 8, kind: input, shape index: {}]   ;;  %s1014_s9 = inlined_call_operand.hbm [shape: bf16[16,256], index: 9, kind: output, shape index: {0}]   ;;  %s1015_s10 = inlined_call_operand.hbm [shape: bf16[16,256], index: 10, kind: output, shape index: {1}]   ;;  %s1016_s11 = inlined_call_operand.hbm [shape: bf16[16,256], index: 11, kind: output, shape index: {2}]  }
   0x1   :  { %18 = vsyncpa [#allocation6], 0 }
   0x2   :  { %19 = vsyncpa [#allocation9], 0 }
   0x3   :  { %20 = vsyncpa [#allocation12], 0 }
   0x4   :  { %21 = vsyncpa [#allocation4], 0 }
   0x5   :  { %22 = vsyncpa [#allocation15], 0  ;;  %s756_s17 = smov [#allocation5]   ;;  %s757_s19 = smov [#allocation8]  }
   0x6   :  { %s40_s18 = sshll.u32 %s756_s17, 4  ;;  %s64_s20 = sshll.u32 %s757_s19, 4  ;;  %s41_s18 = int_to_ptr.vmem [resolvable:$true] %s40_s18  ;;  %s830_s20 = int_to_ptr.vmem [resolvable:$true] %s64_s20 }
   0x7   :  { %s546_s23 = scalar_lea.hbm %s1006_s1, 128 }
   0x8   :  { %p547_p0 = scmp.ne.s32.totalorder %s1006_s1, %s546_s23  ;;  %p550_p1 = scmp.lt.u32.totalorder %s546_s23, %s1006_s1 }
   0xa   :  { %p552_p2 = pnand %p550_p1, %p547_p0 }
   0xc   :  { %555 = shalt.err (!%p552_p2)
}
   0xd   :  { %s556_s28 = scalar_lea.vmem %s41_s18, 128  ;;  %p561_p4 = scmp.lt.s32.totalorder %s41_s18, %s41_s18 }
   0xe   :  { %p557_p3 = scmp.ne.s32.totalorder %s41_s18, %s556_s28  ;;  %p562_p5 = scmp.lt.s32.totalorder %s556_s28, %s556_s28 }
  0x10   :  { %p563_p6 = por %p562_p5, %p561_p4 }
  0x12   :  { %p564_p7 = pnand %p563_p6, %p557_p3 }
  0x14   :  { %567 = shalt.err (!%p564_p7)
}
  0x15   :  { %s758_s29 = smov 64   ;;  %s759_s30 = smov 4  }
  0x16   :  { %46 = dma.hbm_to_vmem [thread:$0]  %s1006_s1, 128, %s41_s18, [#allocation6], %s758_s29, %s758_s29, %s759_s30  }
  0x17   :  { %s568_s16 = scalar_lea.hbm %s1008_s3, 512 }
  0x18   :  { %p569_p8 = scmp.ne.s32.totalorder %s1008_s3, %s568_s16  ;;  %p572_p9 = scmp.lt.u32.totalorder %s568_s16, %s1008_s3 }
  0x1a   :  { %p574_p10 = pnand %p572_p9, %p569_p8 }
  0x1c   :  { %577 = shalt.err (!%p574_p10)
}
  0x1d   :  { %s578_s23 = scalar_lea.vmem %s830_s20, 512  ;;  %p583_p12 = scmp.lt.s32.totalorder %s830_s20, %s830_s20 }
  0x1e   :  { %p579_p11 = scmp.ne.s32.totalorder %s830_s20, %s578_s23  ;;  %p584_p13 = scmp.lt.s32.totalorder %s578_s23, %s578_s23 }
  0x20   :  { %p585_p0 = por %p584_p13, %p583_p12 }
  0x22   :  { %p586_p1 = pnand %p585_p0, %p579_p11 }
  0x24   :  { %589 = shalt.err (!%p586_p1)
}
  0x25   :  { %s760_s1 = smov 128   ;;  %s761_s18 = smov 8  }
  0x26   :  { %70 = dma.hbm_to_vmem [thread:$0]  %s1008_s3, 512, %s830_s20, [#allocation9], %s760_s1, %s760_s1, %s761_s18  }
  0x27   :  { %s762_s26 = smov [#allocation2]   ;;  %s763_s28 = smov [#allocation7]  }
  0x28   :  { %s28_s27 = sshll.u32 %s762_s26, 4  ;;  %s52_s12 = sshll.u32 %s763_s28, 4  ;;  %s29_s27 = int_to_ptr.vmem [resolvable:$true] %s28_s27  ;;  %s867_s12 = int_to_ptr.vmem [resolvable:$true] %s52_s12 }
  0x29   :  { %s590_s15 = scalar_lea.hbm %s1005_s0, 128 }
  0x2a   :  { %p591_p2 = scmp.ne.s32.totalorder %s1005_s0, %s590_s15  ;;  %p594_p3 = scmp.lt.u32.totalorder %s590_s15, %s1005_s0 }
  0x2c   :  { %p596_p4 = pnand %p594_p3, %p591_p2 }
  0x2e   :  { %599 = shalt.err (!%p596_p4)
}
  0x2f   :  { %s600_s3 = scalar_lea.vmem %s29_s27, 128  ;;  %p605_p6 = scmp.lt.s32.totalorder %s29_s27, %s29_s27 }
  0x30   :  { %p601_p5 = scmp.ne.s32.totalorder %s29_s27, %s600_s3  ;;  %p606_p7 = scmp.lt.s32.totalorder %s600_s3, %s600_s3 }
  0x32   :  { %p607_p8 = por %p606_p7, %p605_p6 }
  0x34   :  { %p608_p9 = pnand %p607_p8, %p601_p5 }
  0x36   :  { %611 = shalt.err (!%p608_p9)
}
  0x37   :  { %34 = dma.hbm_to_vmem [thread:$0]  %s1005_s0, 128, %s29_s27, [#allocation3], %s758_s29, %s758_s29, %s759_s30  }
  0x38   :  { %s612_s25 = scalar_lea.hbm %s1007_s2, 128 }
  0x39   :  { %p613_p10 = scmp.ne.s32.totalorder %s1007_s2, %s612_s25  ;;  %p616_p11 = scmp.lt.u32.totalorder %s612_s25, %s1007_s2 }
  0x3b   :  { %p618_p12 = pnand %p616_p11, %p613_p10 }
  0x3d   :  { %621 = shalt.err (!%p618_p12)
}
  0x3e   :  { %s622_s15 = scalar_lea.vmem %s867_s12, 128  ;;  %p627_p0 = scmp.lt.s32.totalorder %s867_s12, %s867_s12 }
  0x3f   :  { %p623_p13 = scmp.ne.s32.totalorder %s867_s12, %s622_s15  ;;  %p628_p1 = scmp.lt.s32.totalorder %s622_s15, %s622_s15 }
  0x41   :  { %p629_p2 = por %p628_p1, %p627_p0 }
  0x43   :  { %p630_p3 = pnand %p629_p2, %p623_p13 }
  0x45   :  { %633 = shalt.err (!%p630_p3)
}
  0x46   :  { %58 = dma.hbm_to_vmem [thread:$0]  %s1007_s2, 128, %s867_s12, [#allocation6], %s758_s29, %s758_s29, %s759_s30  }
  0x47   :  { %s764_s16 = smov [#allocation10]   ;;  %s765_s19 = smov [#allocation11]  }
  0x48   :  { %s78_s17 = sshll.u32 %s764_s16, 4  ;;  %s92_s21 = sshll.u32 %s765_s19, 4  ;;  %s79_s17 = int_to_ptr.vmem [resolvable:$true] %s78_s17  ;;  %s904_s21 = int_to_ptr.vmem [resolvable:$true] %s92_s21 }
  0x49   :  { %s634_s22 = scalar_lea.hbm %s1010_s5, 512 }
  0x4a   :  { %p635_p4 = scmp.ne.s32.totalorder %s1010_s5, %s634_s22  ;;  %p638_p5 = scmp.lt.u32.totalorder %s634_s22, %s1010_s5 }
  0x4c   :  { %p640_p6 = pnand %p638_p5, %p635_p4 }
  0x4e   :  { %643 = shalt.err (!%p640_p6)
}
  0x4f   :  { %s644_s2 = scalar_lea.vmem %s79_s17, 512  ;;  %p649_p8 = scmp.lt.s32.totalorder %s79_s17, %s79_s17 }
  0x50   :  { %p645_p7 = scmp.ne.s32.totalorder %s79_s17, %s644_s2  ;;  %p650_p9 = scmp.lt.s32.totalorder %s644_s2, %s644_s2 }
  0x52   :  { %p651_p10 = por %p650_p9, %p649_p8 }
  0x54   :  { %p652_p11 = pnand %p651_p10, %p645_p7 }
  0x56   :  { %655 = shalt.err (!%p652_p11)
}
  0x57   :  { %84 = dma.hbm_to_vmem [thread:$0]  %s1010_s5, 512, %s79_s17, [#allocation9], %s760_s1, %s760_s1, %s761_s18  }
  0x58   :  { %s656_s13 = scalar_lea.hbm %s1012_s7, 512 }
  0x59   :  { %p657_p12 = scmp.ne.s32.totalorder %s1012_s7, %s656_s13  ;;  %p660_p13 = scmp.lt.u32.totalorder %s656_s13, %s1012_s7 }
  0x5b   :  { %p662_p0 = pnand %p660_p13, %p657_p12 }
  0x5d   :  { %665 = shalt.err (!%p662_p0)
}
  0x5e   :  { %s666_s16 = scalar_lea.vmem %s904_s21, 512  ;;  %p671_p2 = scmp.lt.s32.totalorder %s904_s21, %s904_s21 }
  0x5f   :  { %p667_p1 = scmp.ne.s32.totalorder %s904_s21, %s666_s16  ;;  %p672_p3 = scmp.lt.s32.totalorder %s666_s16, %s666_s16 }
  0x61   :  { %p673_p4 = por %p672_p3, %p671_p2 }
  0x63   :  { %p674_p5 = pnand %p673_p4, %p667_p1 }
  0x65   :  { %677 = shalt.err (!%p674_p5)
}
  0x66   :  { %98 = dma.hbm_to_vmem [thread:$0]  %s1012_s7, 512, %s904_s21, [#allocation12], %s760_s1, %s760_s1, %s761_s18  }
  0x67   :  { %744 = dma.done.wait [#allocation3], 128  }
  0x68   :  { %745 = vsyncadd [#allocation3], 4294967168 }
  0x69   :  { %746 = dma.done.wait [#allocation6], 256  }
  0x6a   :  { %747 = vsyncadd [#allocation6], 4294967040 }
  0x6b   :  { %748 = dma.done.wait [#allocation9], 1024  }
  0x6c   :  { %749 = vsyncadd [#allocation9], 4294966272 }
  0x6d   :  { %750 = dma.done.wait [#allocation12], 512  }
  0x6e   :  { %751 = vsyncadd [#allocation12], 4294966784  ;;  %v766_v0 = vmov 0   ;;  %v525_v1 = vld [vmem:[#allocation8 + $0x4] ss:$8 sps:$4 sm:$0xff]   ;;  %vm163_vm0 = vcmask 261120   ;;  %v128_v16 = vlaneseq }
  0x6f   :  { %199 = vmatprep.mubr.bf16.mxu0 %v766_v0  ;;  %302 = vmatprep.mubr.bf16.mxu1 %v766_v0  ;;  %v527_v2 = vld [vmem:[#allocation8] ss:$8 sps:$4 sm:$0xff]   ;;  %v528_v3 = vld [vmem:[#allocation8 + $0x14] ss:$8 sps:$4 sm:$0xff]   ;;  %v530_v4 = vld [vmem:[#allocation8 + $0x10] ss:$8 sps:$4 sm:$0xff]  }
  0x70   :  { %167 = vmatprep.subr.bf16.mxu0 %v525_v1  ;;  %v531_v5 = vld [vmem:[#allocation10 + $0x4] ss:$8 sps:$4 sm:$0xff]   ;;  %v533_v6 = vld [vmem:[#allocation10] ss:$8 sps:$4 sm:$0xff]   ;;  %v538_v10 = vld [vmem:[#allocation10 + $0x14] ss:$8 sps:$4 sm:$0xff]  }
  0x71   :  { %168 = vmatpush1.bf16.msra.mxu0 %v527_v2  ;;  %v534_v7 = vld [vmem:[#allocation2] sm:$0xff]   ;;  %270 = vmatprep.subr.bf16.mxu1 %v531_v5  ;;  %v540_v11 = vld [vmem:[#allocation10 + $0x10] ss:$8 sps:$4 sm:$0xff]   ;;  %v543_v12 = vld [vmem:[#allocation11 + $0x14] ss:$8 sps:$4 sm:$0xff]   ;;  %v129_v17 = vshrl.u32 %v128_v16, 7 }
  0x72   :  { %169 = vmatprep.subr.bf16.mxu0 %v528_v3  ;;  %v535_v8 = vld [vmem:[#allocation11] ss:$8 sps:$4 sm:$0xff]   ;;  %271 = vmatpush1.bf16.msra.mxu1 %v533_v6  ;;  %v537_v9 = vld [vmem:[#allocation11 + $0x4] ss:$8 sps:$4 sm:$0xff]   ;;  %v544_v13 = vld [vmem:[#allocation5] sm:$0xff]  }
  0x73   :  { %272 = vmatprep.subr.bf16.mxu1 %v538_v10  ;;  %v541_v14 = vld [vmem:[#allocation11 + $0x10] ss:$8 sps:$4 sm:$0xff]   ;;  %v130_v18 = vsub.s32 0, %v129_v17  ;;  %v126_v19 = vld [vmem:[%s1009_s4] sm:$0x3]  ;;  %v134_v20 = vsub.s32 1, %v129_v17 }
  0x74   :  { %v545_v15 = vld [vmem:[#allocation7] sm:$0xff]   ;;  %v230_v22 = vld [vmem:[%s1011_s6] sm:$0x3]  ;;  %s767_s4 = smov [#allocation13]   ;;  %s768_s6 = smov [#allocation14]  }
  0x75   :  { %170 = vmatpush1.bf16.msra.mxu0 %v530_v4  ;;  %v131_v21 = vrot.slane %v126_v19, %v130_v18  ;;  %v135_v23 = vrot.slane %v126_v19, %v134_v20  ;;  %v235_v25 = vrot.slane %v230_v22, %v130_v18  ;;  %v239_v28 = vrot.slane %v230_v22, %v134_v20  ;;  %v333_v31 = vld [vmem:[%s1013_s8] sm:$0x3]  ;;  %s435_s23 = sshll.u32 %s767_s4, 4  ;;  %s447_s24 = sshll.u32 %s768_s6, 4  ;;  %s436_s23 = int_to_ptr.vmem [resolvable:$true] %s435_s23  ;;  %s953_s24 = int_to_ptr.vmem [resolvable:$true] %s447_s24 }
  0x76   :  { %373 = vmatprep.subr.bf16.mxu0 %v537_v9  ;;  %273 = vmatpush1.bf16.msra.mxu1 %v540_v11  ;;  %v338_v41 = vrot.slane %v333_v31, %v130_v18  ;;  %v342_v45 = vrot.slane %v333_v31, %v134_v20  ;;  %s678_s8 = scalar_lea.vmem %s436_s23, 256  ;;  %p683_p7 = scmp.lt.s32.totalorder %s436_s23, %s436_s23 }
  0x77   :  { %p679_p6 = scmp.ne.s32.totalorder %s436_s23, %s678_s8  ;;  %p684_p8 = scmp.lt.s32.totalorder %s678_s8, %s678_s8 }
  0x78   :  { %486 = vmatmul.mubr.msk.bf16.vlgmr.msra.gmra.mrb[0].mxu0 %vm163_vm0, %v534_v7 }
  0x79   :  { %374 = vmatpush1.bf16.msra.mxu0 %v535_v8  ;;  %405 = vmatprep.mubr.bf16.mxu0 %v766_v0  ;;  %p685_p9 = por %p684_p8, %p683_p7 }
  0x7a   :  { %375 = vmatprep.subr.bf16.mxu0 %v543_v12  ;;  %494 = vmatmul.mubr.msk.bf16.vlgmr.msra.gmra.mrb[0].mxu1 %vm163_vm0, %v544_v13 }
  0x7b   :  { %p686_p10 = pnand %p685_p9, %p679_p6 }
  0x7d   :  { %376 = vmatpush1.bf16.msra.mxu0 %v541_v14 }
  0x80   :  { %502 = vmatmul.mubr.msk.bf16.vlgmr.msra.gmra.mrb[4].mxu0 %vm163_vm0, %v545_v15 }
 0x14b   :  { %v201_v24 = vpop.f32.mrb[0].mxu0 }
 0x14c   :  { %v202_v26 = vadd.f32 %v201_v24, %v131_v21  ;;  %v203_v27 = vpop.f32.mrb[1].mxu0 }
 0x14d   :  { %v204_v29 = vadd.f32 %v203_v27, %v135_v23  ;;  %v205_v30 = vpop.f32.mrb[2].mxu0  ;;  %v304_v34 = vpop.f32.mrb[0].mxu1 }
 0x14e   :  { %v206_v32 = vadd.f32 %v205_v30, %v131_v21  ;;  %v207_v33 = vpop.f32.mrb[3].mxu0  ;;  %v305_v37 = vadd.f32 %v304_v34, %v235_v25  ;;  %v306_v38 = vpop.f32.mrb[1].mxu1 }
 0x14f   :  { %v505_v35 = vpack.c.bf16 %v204_v29, %v202_v26  ;;  %v208_v36 = vadd.f32 %v207_v33, %v135_v23  ;;  %v307_v39 = vadd.f32 %v306_v38, %v239_v28  ;;  %v308_v40 = vpop.f32.mrb[2].mxu1 }
 0x150   :  { %v309_v43 = vadd.f32 %v308_v40, %v235_v25  ;;  %v310_v44 = vpop.f32.mrb[3].mxu1 }
 0x151   :  { %222 = vst [vmem:[#allocation13] sm:$0xff] %v505_v35  ;;  %v506_v42 = vpack.c.bf16 %v208_v36, %v206_v32  ;;  %v507_v46 = vpack.c.bf16 %v307_v39, %v305_v37  ;;  %v311_v47 = vadd.f32 %v310_v44, %v239_v28 }
 0x153   :  { %223 = vst [vmem:[#allocation13 + $0x8] sm:$0xff] %v506_v42  ;;  %v407_v48 = vpop.f32.mrb[4].mxu0  ;;  %325 = vst [vmem:[#allocation14] sm:$0xff] %v507_v46  ;;  %v508_v49 = vpack.c.bf16 %v311_v47, %v309_v43 }
 0x154   :  { %v408_v50 = vadd.f32 %v407_v48, %v338_v41  ;;  %v409_v51 = vpop.f32.mrb[5].mxu0 }
 0x155   :  { %689 = shalt.err (!%p686_p10)
}
 0x156   :  { %s690_s2 = scalar_lea.hbm %s1014_s9, 256 }
 0x157   :  { %p691_p11 = scmp.ne.s32.totalorder %s1014_s9, %s690_s2  ;;  %p694_p12 = scmp.lt.u32.totalorder %s690_s2, %s1014_s9 }
 0x159   :  { %p696_p13 = pnand %p694_p12, %p691_p11 }
 0x15b   :  { %699 = shalt.err (!%p696_p13)
}
 0x15c   :  { %441 = dma.vmem_to_hbm [thread:$0]  %s436_s23, 256, %s1014_s9, [#allocation4], %s760_s1, %s760_s1, %s761_s18   ;;  %v410_v52 = vadd.f32 %v409_v51, %v342_v45  ;;  %v411_v53 = vpop.f32.mrb[6].mxu0  ;;  %326 = vst [vmem:[#allocation14 + $0x8] sm:$0xff] %v508_v49 }
 0x15d   :  { %v412_v54 = vadd.f32 %v411_v53, %v338_v41  ;;  %v413_v55 = vpop.f32.mrb[7].mxu0  ;;  %s769_s15 = smov [#allocation16]   ;;  %s700_s27 = scalar_lea.vmem %s953_s24, 256 }
 0x15e   :  { %s459_s0 = sshll.u32 %s769_s15, 4  ;;  %v509_v56 = vpack.c.bf16 %v410_v52, %v408_v50  ;;  %v414_v57 = vadd.f32 %v413_v55, %v342_v45  ;;  %p701_p0 = scmp.ne.s32.totalorder %s953_s24, %s700_s27  ;;  %s460_s0 = int_to_ptr.vmem [resolvable:$true] %s459_s0 }
 0x15f   :  { %p705_p1 = scmp.lt.s32.totalorder %s953_s24, %s953_s24  ;;  %p706_p2 = scmp.lt.s32.totalorder %s700_s27, %s700_s27 }
 0x161   :  { %p707_p3 = por %p706_p2, %p705_p1 }
 0x163   :  { %p708_p4 = pnand %p707_p3, %p701_p0 }
 0x165   :  { %711 = shalt.err (!%p708_p4)
}
 0x166   :  { %s712_s9 = scalar_lea.hbm %s1015_s10, 256 }
 0x167   :  { %p713_p5 = scmp.ne.s32.totalorder %s1015_s10, %s712_s9  ;;  %p716_p6 = scmp.lt.u32.totalorder %s712_s9, %s1015_s10 }
 0x169   :  { %p718_p7 = pnand %p716_p6, %p713_p5 }
 0x16b   :  { %721 = shalt.err (!%p718_p7)
}
 0x16c   :  { %453 = dma.vmem_to_hbm [thread:$0]  %s953_s24, 256, %s1015_s10, [#allocation15], %s760_s1, %s760_s1, %s761_s18   ;;  %428 = vst [vmem:[#allocation16] sm:$0xff] %v509_v56  ;;  %v510_v58 = vpack.c.bf16 %v414_v57, %v412_v54 }
 0x16d   :  { %s722_s22 = scalar_lea.vmem %s460_s0, 256  ;;  %p727_p9 = scmp.lt.s32.totalorder %s460_s0, %s460_s0 }
 0x16e   :  { %429 = vst [vmem:[#allocation16 + $0x8] sm:$0xff] %v510_v58  ;;  %p723_p8 = scmp.ne.s32.totalorder %s460_s0, %s722_s22  ;;  %p728_p10 = scmp.lt.s32.totalorder %s722_s22, %s722_s22 }
 0x170   :  { %p729_p11 = por %p728_p10, %p727_p9 }
 0x172   :  { %p730_p12 = pnand %p729_p11, %p723_p8 }
 0x174   :  { %733 = shalt.err (!%p730_p12)
}
 0x175   :  { %s734_s6 = scalar_lea.hbm %s1016_s11, 256 }
 0x176   :  { %p735_p13 = scmp.ne.s32.totalorder %s1016_s11, %s734_s6  ;;  %p738_p0 = scmp.lt.u32.totalorder %s734_s6, %s1016_s11 }
 0x178   :  { %p740_p1 = pnand %p738_p0, %p735_p13 }
 0x17a   :  { %743 = shalt.err (!%p740_p1)
}
 0x17b   :  { %465 = dma.vmem_to_hbm [thread:$0]  %s460_s0, 256, %s1016_s11, [#allocation15], %s760_s1, %s760_s1, %s761_s18  }
 0x17c   :  { %752 = dma.done.wait [#allocation4], 256  }
 0x17d   :  { %753 = vsyncadd [#allocation4], 4294967040 }
 0x17e   :  { %754 = dma.done.wait [#allocation15], 512  }
 0x17f   :  { %755 = vsyncadd [#allocation15], 4294966784 }
 0x180   :  { %475 = vsyncpa [#allocation3], 1 }
 0x181   :  { %476 = vsyncpa [#allocation6], 1 }
 0x182   :  { %477 = vsyncpa [#allocation9], 1 }
 0x183   :  { %478 = vsyncpa [#allocation12], 1 }
 0x184   :  { %479 = vsyncpa [#allocation4], 1 }
 0x185   :  { %480 = vsyncpa [#allocation15], 1 }

</bundles_post_ra>
